<compile_context>
chip_gen: v6e
topology: v6e:2x2x1
jax: 0.10.0
libtpu: 0.0.40
codegen_flags: <defaults>
</compile_context>

<pallas_src>
import functools

import numpy as np

import jax
import jax.numpy as jnp
from jax import lax
from jax.experimental import pallas as pl
from jax.experimental.pallas import tpu as pltpu


def _round_up(v, m):
    return (v + m - 1) // m * m


def _pick_cout_tile(c_out):
    if c_out <= 128:
        return c_out
    for cand in (128, 64, 32, 16, 8):
        if c_out % cand == 0:
            return cand
    return c_out


def convlayer_kernel(x_ref, w_ref, p_ref, m_ref, o_ref, panel_ref, *,
                     k, wp, cin, qt, n_chunks, inv_count, eps):
    # x_ref:     (Cin, L)        zero-padded image, spatially flattened (bf16)
    # w_ref:     (CT, Cin*K*K)   he-scaled weights, tap-major contraction dim
    # p_ref:     (CT, 2)         columns = (gamma, beta)
    # m_ref:     (1, Q)          1.0 at valid (strided, non-garbage) positions
    # o_ref:     (CT, Q)         output block (f32)
    # panel_ref: (Cin*K*K, QT)   shifted-tap panel scratch (bf16)
    cout_t = o_ref.shape[0]
    w2d = w_ref[...]                                   # small, resident

    s = jnp.zeros((cout_t, 1), jnp.float32)
    ss = jnp.zeros((cout_t, 1), jnp.float32)

    # Pass 1: fused-im2col conv — one MXU matmul per Q-chunk (contraction depth
    # Cin*K*K) — plus masked single-pass statistics (sum, sum of squares).
    for c in range(n_chunks):                          # static chunk count
        base = c * qt
        for kh in range(k):
            for kw in range(k):
                t = kh * k + kw
                off = base + kh * wp + kw
                panel_ref[t * cin:(t + 1) * cin, :] = x_ref[:, off:off + qt]
        y = jnp.dot(w2d, panel_ref[...],
                    preferred_element_type=jnp.float32)        # (CT, QT) f32
        o_ref[:, base:base + qt] = y                           # pre-norm stash
        ym = y * m_ref[:, base:base + qt]
        s = s + jnp.sum(ym, axis=-1, keepdims=True)
        ss = ss + jnp.sum(ym * y, axis=-1, keepdims=True)

    mean = s * inv_count
    var = jnp.maximum(ss * inv_count - mean * mean, 0.0)
    scale = p_ref[:, 0:1] * lax.rsqrt(var + eps)       # gamma / sqrt(var+eps)
    shift = p_ref[:, 1:2] - mean * scale               # beta - mean*scale

    # Pass 2: fused normalize + ELU in place on the VMEM output block.
    for c in range(n_chunks):
        base = c * qt
        yn = o_ref[:, base:base + qt] * scale + shift
        o_ref[:, base:base + qt] = jnp.where(
            yn > 0, yn, jnp.exp(jnp.minimum(yn, 0.0)) - 1.0)


def conv_layer_forward(x_nchw, weight, bias, gamma, beta, *,
                       kernel_size, stride=1, eps=1e-5,
                       compute_dtype=jnp.bfloat16, q_chunk=2048):
    """Pallas ConvLayer.forward (defaults: use_norm+affine, ELU, use_wscale)."""
    # Conv bias is exactly cancelled by the InstanceNorm mean subtraction, so
    # it is intentionally not used (matches the reference output).
    del bias

    n, c_in, h, w = x_nchw.shape
    c_out = weight.shape[0]
    k = kernel_size
    pad = k // 2
    he_std = float(np.sqrt(2.0 / (c_in * k * k)))

    hp, wp = h + 2 * pad, w + 2 * pad
    h1, w1 = hp - k + 1, wp - k + 1                  # dense (stride-1) extents
    ho = (h + 2 * pad - k) // stride + 1             # strided output extents
    wo = (w + 2 * pad - k) // stride + 1

    q_raw = h1 * wp
    qt = _round_up(min(int(q_chunk), _round_up(q_raw, 128)), 128)   # lane chunk
    q = _round_up(q_raw, qt)                                        # total lanes
    n_chunks = q // qt

    l_needed = q + (k - 1) * (wp + 1)                # last tap slice must fit
    deficit = max(0, l_needed - hp * wp)
    extra_rows = -(-deficit // wp)
    l = (hp + extra_rows) * wp

    # ONE fused host pass: spatial + alignment pad and cast to compute dtype;
    # the reshape to the flattened [N, Cin, L] layout is free (contiguous).
    xflat = jnp.pad(
        x_nchw, ((0, 0), (0, 0), (pad, pad + extra_rows), (pad, pad))
    ).astype(compute_dtype).reshape(n, c_in, l)

    # Weights -> (Cout, K*K*Cin), tap-major to match the panel row ordering.
    ckk = c_in * k * k
    w2d = (he_std * weight).transpose(0, 2, 3, 1).reshape(c_out, ckk)
    w2d = w2d.astype(compute_dtype)

    # gamma / beta merged into one tiny resident operand (Cout, 2).
    params = jnp.stack([gamma, beta], axis=1).astype(jnp.float32)

    # Mask of valid (stride-sampled, non-garbage) positions on the dense grid.
    rr = np.arange(h1)
    cc = np.arange(wp)
    row_ok = (rr % stride == 0) & (rr // stride < ho)
    col_ok = (cc % stride == 0) & (cc // stride < wo)
    mask_np = (row_ok[:, None] & col_ok[None, :]).astype(np.float32).reshape(-1)
    mask = jnp.asarray(np.pad(mask_np, (0, q - q_raw)).reshape(1, q))

    ct = _pick_cout_tile(c_out)                      # 2nd parallel grid axis
    n_ct = c_out // ct

    kernel = functools.partial(
        convlayer_kernel, k=k, wp=wp, cin=c_in, qt=qt, n_chunks=n_chunks,
        inv_count=1.0 / float(ho * wo), eps=float(eps))

    itm = jnp.dtype(compute_dtype).itemsize
    flops = int(n * 2 * c_out * ckk * q + n * 10 * c_out * q)
    bytes_accessed = int(n * n_ct * c_in * l * itm + n * c_out * q * 4
                         + c_out * ckk * itm + c_out * 8 + q * 4)

    vmem_need = (2 * c_in * l * itm                  # input (double buffered)
                 + 2 * ct * q * 4                    # output (double buffered)
                 + 2 * ct * ckk * itm + 2 * ct * 8 + 2 * q * 4
                 + ckk * qt * itm                    # panel scratch
                 + 8 * ct * qt * 4)                  # elementwise temporaries
    vmem_limit = int(min(max(vmem_need + (8 << 20), 32 << 20), 64 << 20))

    dense = pl.pallas_call(
        kernel,
        out_shape=jax.ShapeDtypeStruct((n, c_out, q), jnp.float32),
        grid_spec=pltpu.PrefetchScalarGridSpec(
            num_scalar_prefetch=0,
            grid=(n, n_ct),
            in_specs=[
                pl.BlockSpec((None, c_in, l), lambda i, j: (i, 0, 0)),  # image
                pl.BlockSpec((ct, ckk), lambda i, j: (j, 0)),           # weights
                pl.BlockSpec((ct, 2), lambda i, j: (j, 0)),             # gamma/beta
                pl.BlockSpec((1, q), lambda i, j: (0, 0)),              # valid mask
            ],
            out_specs=pl.BlockSpec((None, ct, q), lambda i, j: (i, j, 0)),
            scratch_shapes=[pltpu.VMEM((ckk, qt), compute_dtype)],
        ),
        compiler_params=pltpu.CompilerParams(
            dimension_semantics=("parallel", "parallel"),
            vmem_limit_bytes=vmem_limit),
        cost_estimate=pl.CostEstimate(
            flops=flops, transcendentals=int(n * c_out * q),
            bytes_accessed=bytes_accessed),
    )(xflat, w2d, params, mask)

    # Output is channels-first & lane-dense: final NCHW is reshape + slice.
    dense = dense[:, :, :q_raw].reshape(n, c_out, h1, wp)
    y = dense[:, :, ::stride, ::stride][:, :, :ho, :wo]
    return y


def _reference_forward(x, weight, bias, gamma, beta, *, kernel_size, stride=1):
    """Pure-JAX f32 reference (mirrors the PyTorch forward) for self-check."""
    c_in = x.shape[1]
    k = kernel_size
    padding = k // 2
    he_std = jnp.sqrt(2.0 / (c_in * k * k)).astype(jnp.float32)
    y = lax.conv_general_dilated(
        x, he_std * weight, window_strides=(stride, stride),
        padding=((padding, padding), (padding, padding)),
        dimension_numbers=("NCHW", "OIHW", "NCHW"))
    y = y + bias.reshape(1, -1, 1, 1)
    mean = jnp.mean(y, axis=(2, 3), keepdims=True)
    var = jnp.mean((y - mean) ** 2, axis=(2, 3), keepdims=True)
    y = (y - mean) / jnp.sqrt(var + 1e-5)
    y = y * gamma.reshape(1, -1, 1, 1) + beta.reshape(1, -1, 1, 1)
    return jnp.where(y > 0, y, jnp.exp(jnp.minimum(y, 0.0)) - 1.0)


if __name__ == "__main__":
    key = jax.random.PRNGKey(0)
    kx, kw = jax.random.split(key)

    N, C_IN, H, W = 2, 4, 16, 16
    C_OUT, K, STRIDE = 8, 3, 1

    x = jax.random.normal(kx, (N, C_IN, H, W), dtype=jnp.float32)
    # nn.init.normal_(weight) -> std-normal; bias=0; InstanceNorm affine: gamma=1, beta=0
    weight = jax.random.normal(kw, (C_OUT, C_IN, K, K), dtype=jnp.float32)
    bias = jnp.zeros((C_OUT,), dtype=jnp.float32)
    gamma = jnp.ones((C_OUT,), dtype=jnp.float32)
    beta = jnp.zeros((C_OUT,), dtype=jnp.float32)

    fwd = jax.jit(functools.partial(conv_layer_forward,
                                    kernel_size=K, stride=STRIDE))
    y = jax.block_until_ready(fwd(x, weight, bias, gamma, beta))

    y_ref = _reference_forward(x, weight, bias, gamma, beta,
                               kernel_size=K, stride=STRIDE)
    assert y.shape == (N, C_OUT, H, W)
    # bf16 matmul operands (f32 accumulation) => loosened tolerance vs f32 ref.
    err = float(jnp.max(jnp.abs(y - y_ref)))
    assert jnp.allclose(y, y_ref, rtol=5e-2, atol=5e-2), err

    print("KERNEL_OK")
</pallas_src>

<mosaic_0001>
module attributes {stable_mosaic.version = 11 : i64} {
  func.func @convlayer_kernel(%arg0: i32, %arg1: i32, %arg2: memref<1x4x432xbf16, #tpu.memory_space<vmem>>, %arg3: memref<8x36xbf16, #tpu.memory_space<vmem>>, %arg4: memref<8x2xf32, #tpu.memory_space<vmem>>, %arg5: memref<1x384xf32, #tpu.memory_space<vmem>>, %arg6: memref<1x8x384xf32, #tpu.memory_space<vmem>>, %arg7: memref<36x384xbf16, #tpu.memory_space<vmem>>) attributes {dimension_semantics = [#tpu.dimension_semantics<parallel>, #tpu.dimension_semantics<parallel>], iteration_bounds = array<i64: 2, 1>, scalar_prefetch = 0 : i64, scratch_operands = 1 : i64, tpu.core_type = #tpu.core_type<tc>, window_params = [{transform_indices = @transform_0, window_bounds = array<i64: 1, 4, 432>}, {transform_indices = @transform_1, window_bounds = array<i64: 8, 36>}, {transform_indices = @transform_2, window_bounds = array<i64: 8, 2>}, {pipeline_mode = #tpu.pipeline_mode<synchronous>, transform_indices = @transform_3, window_bounds = array<i64: 1, 384>}, {transform_indices = @transform_4, window_bounds = array<i64: 1, 8, 384>}]} {
    %c0 = arith.constant 0 : index
    %c0_0 = arith.constant 0 : index
    %0 = vector.load %arg3[%c0, %c0_0] : memref<8x36xbf16, #tpu.memory_space<vmem>>, vector<8x36xbf16>
    %cst = arith.constant 0.000000e+00 : f32
    %1 = vector.broadcast %cst : f32 to vector<8x1xf32>
    %cst_1 = arith.constant 0.000000e+00 : f32
    %2 = vector.broadcast %cst_1 : f32 to vector<8x1xf32>
    %c0_2 = arith.constant 0 : index
    %c0_3 = arith.constant 0 : index
    %c0_4 = arith.constant 0 : index
    %3 = vector.load %arg2[%c0_2, %c0_3, %c0_4] : memref<1x4x432xbf16, #tpu.memory_space<vmem>>, vector<1x4x384xbf16>
    %4 = vector.shape_cast %3 : vector<1x4x384xbf16> to vector<4x384xbf16>
    %c0_5 = arith.constant 0 : index
    %c0_6 = arith.constant 0 : index
    %5 = vector.load %arg7[%c0_5, %c0_6] : memref<36x384xbf16, #tpu.memory_space<vmem>>, vector<4x384xbf16>
    tpu.vector_store %arg7[%c0_5, %c0_6], %4 {strides = array<i32>} : memref<36x384xbf16, #tpu.memory_space<vmem>>, vector<4x384xbf16>,
    %c0_7 = arith.constant 0 : index
    %c0_8 = arith.constant 0 : index
    %c1 = arith.constant 1 : index
    %6 = vector.load %arg2[%c0_7, %c0_8, %c1] : memref<1x4x432xbf16, #tpu.memory_space<vmem>>, vector<1x4x384xbf16>
    %7 = vector.shape_cast %6 : vector<1x4x384xbf16> to vector<4x384xbf16>
    %c4 = arith.constant 4 : index
    %c0_9 = arith.constant 0 : index
    %8 = vector.load %arg7[%c4, %c0_9] : memref<36x384xbf16, #tpu.memory_space<vmem>>, vector<4x384xbf16>
    tpu.vector_store %arg7[%c4, %c0_9], %7 {strides = array<i32>} : memref<36x384xbf16, #tpu.memory_space<vmem>>, vector<4x384xbf16>,
    %c0_10 = arith.constant 0 : index
    %c0_11 = arith.constant 0 : index
    %c2 = arith.constant 2 : index
    %9 = vector.load %arg2[%c0_10, %c0_11, %c2] : memref<1x4x432xbf16, #tpu.memory_space<vmem>>, vector<1x4x384xbf16>
    %10 = vector.shape_cast %9 : vector<1x4x384xbf16> to vector<4x384xbf16>
    %c8 = arith.constant 8 : index
    %c0_12 = arith.constant 0 : index
    %11 = vector.load %arg7[%c8, %c0_12] : memref<36x384xbf16, #tpu.memory_space<vmem>>, vector<4x384xbf16>
    tpu.vector_store %arg7[%c8, %c0_12], %10 {strides = array<i32>} : memref<36x384xbf16, #tpu.memory_space<vmem>>, vector<4x384xbf16>,
    %c0_13 = arith.constant 0 : index
    %c0_14 = arith.constant 0 : index
    %c18 = arith.constant 18 : index
    %12 = vector.load %arg2[%c0_13, %c0_14, %c18] : memref<1x4x432xbf16, #tpu.memory_space<vmem>>, vector<1x4x384xbf16>
    %13 = vector.shape_cast %12 : vector<1x4x384xbf16> to vector<4x384xbf16>
    %c12 = arith.constant 12 : index
    %c0_15 = arith.constant 0 : index
    %14 = vector.load %arg7[%c12, %c0_15] : memref<36x384xbf16, #tpu.memory_space<vmem>>, vector<4x384xbf16>
    tpu.vector_store %arg7[%c12, %c0_15], %13 {strides = array<i32>} : memref<36x384xbf16, #tpu.memory_space<vmem>>, vector<4x384xbf16>,
    %c0_16 = arith.constant 0 : index
    %c0_17 = arith.constant 0 : index
    %c19 = arith.constant 19 : index
    %15 = vector.load %arg2[%c0_16, %c0_17, %c19] : memref<1x4x432xbf16, #tpu.memory_space<vmem>>, vector<1x4x384xbf16>
    %16 = vector.shape_cast %15 : vector<1x4x384xbf16> to vector<4x384xbf16>
    %c16 = arith.constant 16 : index
    %c0_18 = arith.constant 0 : index
    %17 = vector.load %arg7[%c16, %c0_18] : memref<36x384xbf16, #tpu.memory_space<vmem>>, vector<4x384xbf16>
    tpu.vector_store %arg7[%c16, %c0_18], %16 {strides = array<i32>} : memref<36x384xbf16, #tpu.memory_space<vmem>>, vector<4x384xbf16>,
    %c0_19 = arith.constant 0 : index
    %c0_20 = arith.constant 0 : index
    %c20 = arith.constant 20 : index
    %18 = vector.load %arg2[%c0_19, %c0_20, %c20] : memref<1x4x432xbf16, #tpu.memory_space<vmem>>, vector<1x4x384xbf16>
    %19 = vector.shape_cast %18 : vector<1x4x384xbf16> to vector<4x384xbf16>
    %c20_21 = arith.constant 20 : index
    %c0_22 = arith.constant 0 : index
    %20 = vector.load %arg7[%c20_21, %c0_22] : memref<36x384xbf16, #tpu.memory_space<vmem>>, vector<4x384xbf16>
    tpu.vector_store %arg7[%c20_21, %c0_22], %19 {strides = array<i32>} : memref<36x384xbf16, #tpu.memory_space<vmem>>, vector<4x384xbf16>,
    %c0_23 = arith.constant 0 : index
    %c0_24 = arith.constant 0 : index
    %c36 = arith.constant 36 : index
    %21 = vector.load %arg2[%c0_23, %c0_24, %c36] : memref<1x4x432xbf16, #tpu.memory_space<vmem>>, vector<1x4x384xbf16>
    %22 = vector.shape_cast %21 : vector<1x4x384xbf16> to vector<4x384xbf16>
    %c24 = arith.constant 24 : index
    %c0_25 = arith.constant 0 : index
    %23 = vector.load %arg7[%c24, %c0_25] : memref<36x384xbf16, #tpu.memory_space<vmem>>, vector<4x384xbf16>
    tpu.vector_store %arg7[%c24, %c0_25], %22 {strides = array<i32>} : memref<36x384xbf16, #tpu.memory_space<vmem>>, vector<4x384xbf16>,
    %c0_26 = arith.constant 0 : index
    %c0_27 = arith.constant 0 : index
    %c37 = arith.constant 37 : index
    %24 = vector.load %arg2[%c0_26, %c0_27, %c37] : memref<1x4x432xbf16, #tpu.memory_space<vmem>>, vector<1x4x384xbf16>
    %25 = vector.shape_cast %24 : vector<1x4x384xbf16> to vector<4x384xbf16>
    %c28 = arith.constant 28 : index
    %c0_28 = arith.constant 0 : index
    %26 = vector.load %arg7[%c28, %c0_28] : memref<36x384xbf16, #tpu.memory_space<vmem>>, vector<4x384xbf16>
    tpu.vector_store %arg7[%c28, %c0_28], %25 {strides = array<i32>} : memref<36x384xbf16, #tpu.memory_space<vmem>>, vector<4x384xbf16>,
    %c0_29 = arith.constant 0 : index
    %c0_30 = arith.constant 0 : index
    %c38 = arith.constant 38 : index
    %27 = vector.load %arg2[%c0_29, %c0_30, %c38] : memref<1x4x432xbf16, #tpu.memory_space<vmem>>, vector<1x4x384xbf16>
    %28 = vector.shape_cast %27 : vector<1x4x384xbf16> to vector<4x384xbf16>
    %c32 = arith.constant 32 : index
    %c0_31 = arith.constant 0 : index
    %29 = vector.load %arg7[%c32, %c0_31] : memref<36x384xbf16, #tpu.memory_space<vmem>>, vector<4x384xbf16>
    tpu.vector_store %arg7[%c32, %c0_31], %28 {strides = array<i32>} : memref<36x384xbf16, #tpu.memory_space<vmem>>, vector<4x384xbf16>,
    %c0_32 = arith.constant 0 : index
    %c0_33 = arith.constant 0 : index
    %30 = vector.load %arg7[%c0_32, %c0_33] : memref<36x384xbf16, #tpu.memory_space<vmem>>, vector<36x384xbf16>
    %cst_34 = arith.constant dense<0.000000e+00> : vector<8x384xf32>
    %31 = tpu.matmul %0, %30, %cst_34 {dimension_numbers = #tpu.dot_dimension_numbers<[1], [0], [0], [1], [0, 0, 1, 1], [], []>} : vector<8x36xbf16>, vector<36x384xbf16>, vector<8x384xf32> -> vector<8x384xf32>
    %c0_35 = arith.constant 0 : index
    %c0_36 = arith.constant 0 : index
    %c0_37 = arith.constant 0 : index
    %32 = vector.load %arg6[%c0_35, %c0_36, %c0_37] : memref<1x8x384xf32, #tpu.memory_space<vmem>>, vector<1x8x384xf32>
    %33 = vector.shape_cast %32 : vector<1x8x384xf32> to vector<8x384xf32>
    %34 = vector.shape_cast %31 : vector<8x384xf32> to vector<1x8x384xf32>
    tpu.vector_store %arg6[%c0_35, %c0_36, %c0_37], %34 {strides = array<i32>} : memref<1x8x384xf32, #tpu.memory_space<vmem>>, vector<1x8x384xf32>,
    %c0_38 = arith.constant 0 : index
    %c0_39 = arith.constant 0 : index
    %35 = vector.load %arg5[%c0_38, %c0_39] : memref<1x384xf32, #tpu.memory_space<vmem>>, vector<1x384xf32>
    %36 = vector.broadcast %35 : vector<1x384xf32> to vector<8x384xf32>
    %37 = arith.mulf %31, %36 : vector<8x384xf32>
    %cst_40 = arith.constant dense<0.000000e+00> : vector<8xf32>
    %38 = vector.multi_reduction <add>, %37, %cst_40 [1] : vector<8x384xf32> to vector<8xf32>
    %39 = vector.shape_cast %38 : vector<8xf32> to vector<8x1xf32>
    %40 = arith.addf %1, %39 : vector<8x1xf32>
    %41 = arith.mulf %37, %31 : vector<8x384xf32>
    %cst_41 = arith.constant dense<0.000000e+00> : vector<8xf32>
    %42 = vector.multi_reduction <add>, %41, %cst_41 [1] : vector<8x384xf32> to vector<8xf32>
    %43 = vector.shape_cast %42 : vector<8xf32> to vector<8x1xf32>
    %44 = arith.addf %2, %43 : vector<8x1xf32>
    %cst_42 = arith.constant 3.906250e-03 : f32
    %45 = vector.broadcast %cst_42 : f32 to vector<8x1xf32>
    %46 = arith.mulf %40, %45 : vector<8x1xf32>
    %cst_43 = arith.constant 3.906250e-03 : f32
    %47 = vector.broadcast %cst_43 : f32 to vector<8x1xf32>
    %48 = arith.mulf %44, %47 : vector<8x1xf32>
    %49 = arith.mulf %46, %46 : vector<8x1xf32>
    %50 = arith.subf %48, %49 : vector<8x1xf32>
    %cst_44 = arith.constant 0.000000e+00 : f32
    %51 = vector.broadcast %cst_44 : f32 to vector<8x1xf32>
    %52 = arith.maximumf %50, %51 : vector<8x1xf32>
    %c0_45 = arith.constant 0 : index
    %c0_46 = arith.constant 0 : index
    %53 = vector.load %arg4[%c0_45, %c0_46] : memref<8x2xf32, #tpu.memory_space<vmem>>, vector<8x1xf32>
    %cst_47 = arith.constant 9.99999974E-6 : f32
    %54 = vector.broadcast %cst_47 : f32 to vector<8x1xf32>
    %55 = arith.addf %52, %54 : vector<8x1xf32>
    %56 = math.rsqrt %55 : vector<8x1xf32>
    %57 = arith.mulf %53, %56 : vector<8x1xf32>
    %c0_48 = arith.constant 0 : index
    %c1_49 = arith.constant 1 : index
    %58 = vector.load %arg4[%c0_48, %c1_49] : memref<8x2xf32, #tpu.memory_space<vmem>>, vector<8x1xf32>
    %59 = arith.mulf %46, %57 : vector<8x1xf32>
    %60 = arith.subf %58, %59 : vector<8x1xf32>
    %c0_50 = arith.constant 0 : index
    %c0_51 = arith.constant 0 : index
    %c0_52 = arith.constant 0 : index
    %61 = vector.load %arg6[%c0_50, %c0_51, %c0_52] : memref<1x8x384xf32, #tpu.memory_space<vmem>>, vector<1x8x384xf32>
    %62 = vector.shape_cast %61 : vector<1x8x384xf32> to vector<8x384xf32>
    %63 = vector.broadcast %57 : vector<8x1xf32> to vector<8x384xf32>
    %64 = arith.mulf %62, %63 : vector<8x384xf32>
    %65 = vector.broadcast %60 : vector<8x1xf32> to vector<8x384xf32>
    %66 = arith.addf %64, %65 : vector<8x384xf32>
    %cst_53 = arith.constant 0.000000e+00 : f32
    %67 = vector.broadcast %cst_53 : f32 to vector<8x384xf32>
    %68 = arith.cmpf ogt, %66, %67 : vector<8x384xf32>
    %cst_54 = arith.constant 0.000000e+00 : f32
    %69 = vector.broadcast %cst_54 : f32 to vector<8x384xf32>
    %70 = arith.minimumf %66, %69 : vector<8x384xf32>
    %71 = math.exp %70 : vector<8x384xf32>
    %cst_55 = arith.constant 1.000000e+00 : f32
    %72 = vector.broadcast %cst_55 : f32 to vector<8x384xf32>
    %73 = arith.subf %71, %72 : vector<8x384xf32>
    %74 = arith.select %68, %66, %73 : vector<8x384xi1>, vector<8x384xf32>
    %c0_56 = arith.constant 0 : index
    %c0_57 = arith.constant 0 : index
    %c0_58 = arith.constant 0 : index
    %75 = vector.load %arg6[%c0_56, %c0_57, %c0_58] : memref<1x8x384xf32, #tpu.memory_space<vmem>>, vector<1x8x384xf32>
    %76 = vector.shape_cast %75 : vector<1x8x384xf32> to vector<8x384xf32>
    %77 = vector.shape_cast %74 : vector<8x384xf32> to vector<1x8x384xf32>
    tpu.vector_store %arg6[%c0_56, %c0_57, %c0_58], %77 {strides = array<i32>} : memref<1x8x384xf32, #tpu.memory_space<vmem>>, vector<1x8x384xf32>,
    return
  }
  func.func @transform_0(%arg0: i32, %arg1: i32) -> (i32, i32, i32) {
    %c0_i32 = arith.constant 0 : i32
    %c0_i32_0 = arith.constant 0 : i32
    %c0_i32_1 = arith.constant 0 : i32
    return %arg0, %c0_i32, %c0_i32_0 : i32, i32, i32
  }
  func.func @transform_1(%arg0: i32, %arg1: i32) -> (i32, i32) {
    %c0_i32 = arith.constant 0 : i32
    %c0_i32_0 = arith.constant 0 : i32
    return %arg1, %c0_i32 : i32, i32
  }
  func.func @transform_2(%arg0: i32, %arg1: i32) -> (i32, i32) {
    %c0_i32 = arith.constant 0 : i32
    %c0_i32_0 = arith.constant 0 : i32
    return %arg1, %c0_i32 : i32, i32
  }
  func.func @transform_3(%arg0: i32, %arg1: i32) -> (i32, i32) {
    %c0_i32 = arith.constant 0 : i32
    %c0_i32_0 = arith.constant 0 : i32
    %c0_i32_1 = arith.constant 0 : i32
    return %c0_i32, %c0_i32_0 : i32, i32
  }
  func.func @transform_4(%arg0: i32, %arg1: i32) -> (i32, i32, i32) {
    %c0_i32 = arith.constant 0 : i32
    %c0_i32_0 = arith.constant 0 : i32
    return %arg0, %arg1, %c0_i32 : i32, i32, i32
  }
}

</mosaic_0001>

<bundles_post_ra>
// kernel: conv_layer_forward.1
= control target key start
LH: loop header
LB: loop body
LE: loop exit
PB: predicated region body
PF: predicated region fallthrough
CT: control target
= control target key end

     0   :  { %s1046_s15 = smov 0   ;;  %s1048_s16 = smov 0   ;;  %s1115_s0 = inlined_call_operand.vmem [shape: bf16[2,4,432], index: 0, kind: input, shape index: {}]   ;;  %s1116_s1 = inlined_call_operand.vmem [shape: bf16[8,36], index: 1, kind: input, shape index: {}]   ;;  %s1117_s2 = inlined_call_operand.vmem [shape: f32[8,2], index: 2, kind: input, shape index: {}]   ;;  %s1118_s3 = inlined_call_operand.vmem [shape: f32[1,384], index: 3, kind: input, shape index: {}]   ;;  %s1119_s4 = inlined_call_operand.vmem [shape: f32[2,8,384], index: 4, kind: output, shape index: {}]  }
   0x1   :  { %s1050_s17 = smov 0  }
   0x2 LB: > { %s26_s18 = sadd.s32 1, %s1001_s16  ;;  %p882_p0 = scmp.ge.s32.totalorder %s1005_s17, 1  ;;  %s1005_s17 = sphi %s1050_s17, %s14_s17   ;;  %s1001_s16 = sphi %s1048_s16, %s1121_s16   ;;  %s997_s15 = sphi %s1046_s15, %s1120_s15  }
   0x3   : > { %p28_p1 = scmp.ge.s32.totalorder %s26_s18, 2  ;;  %p194_p2 = scmp.lt.s32.totalorder %s1005_s17, 3 }
   0x5   : > { %s1123_s18 = smov (%p28_p1, %s26_s18), 0  ;;  %p195_p3 = pnand %p882_p0, %p194_p2 }
   0x6   : > { %p232_p4 = scmp.lt.s32.totalorder (!%p195_p3), %s997_s15, 1  ;;  %s1008_s23 = smov (!%p195_p3), 90  }
   0x7   : > { %198 = sbr.rel (%p195_p3) target bundleno = 814 (0x32e), region = 36  ;;  %s1009_s24 = smov (!%p195_p3), 109  }
   0x8   : > { %s1011_s25 = smov (!%p195_p3), 108   ;;  %s1012_s26 = smov (!%p195_p3), 92  }
   0x9   : > { %s1013_s27 = smov (!%p195_p3), 91   ;;  %s1014_s28 = smov (!%p195_p3), 127  }
   0xa   : > { %s1015_s29 = smov (!%p195_p3), 126   ;;  %s1016_s30 = smov (!%p195_p3), 110  }
   0xb   : > { %s1020_s11 = smov (!%p195_p3), 1  }
   0xc   : > { %v283_v0 = vlaneseq  ;;  %v1007_v1 = vmov 1983009808   ;;  %s1125_s15 = smov (!%p232_p4, %s997_s15), 1  ;;  %v1010_v11 = vmov 0.0   ;;  %vm1017_vm0 = vmmov 0  }
   0xd   : > { %v281_v2 = vunpack.c.l.s4 %v1007_v1  ;;  %s905_s19 = sshll.u32 %s1125_s15, 3  ;;  %910 = vmatprep.subr.bf16.mxu1 %v1010_v11  ;;  %916 = vmatprep.mubr.msk.bf16.mxu1 %vm1017_vm0, %v1010_v11  ;;  %v1018_v15 = vmov 0   ;;  %vm300_vm1 = vcmask 1043456   ;;  %vm519_vm2 = vcmask 736256   ;;  %s920_s12 = smul.u32 24, %s1125_s15 }
   0xe   : > { %v1066_v3 = vshrl.u32 %v283_v0, 7  ;;  %s236_s22 = scalar_lea.vmem %s1115_s0, %s905_s19  ;;  %622 = vmatprep.mubr.bf16.mxu0 %v1018_v15  ;;  %959 = vset.pattern.permute.xlu1 %v1018_v15  ;;  %vm426_vm3 = vcmask 883712   ;;  %vm395_vm4 = vcmask 891904   ;;  %vm457_vm5 = vcmask 752640  }
   0xf   : > { %v282_v4 = vunpack.c.0.s8 %v281_v2  ;;  %v495_v6 = vld [vmem:[%s236_s22] sm:$0xff]  ;;  %vm580_vm6 = vcmask 1041408   ;;  %vm488_vm7 = vcmask 744448   ;;  %vm302_vm8 = vcmask 1039360   ;;  %s253_s19 = scalar_lea.vmem %s1119_s4, %s920_s12 }
  0x10   : > { %v497_v8 = vcombine.high %v495_v6, %v495_v6  ;;  %v404_v10 = vcombine.low %v495_v6, %v495_v6  ;;  %v256_v13 = vld [vmem:[%s236_s22] sm:$0x3f]  ;;  %vm333_vm9 = vcmask 1031168   ;;  %vm364_vm10 = vcmask 900096  }
  0x11   : > { %v285_v5 = vsub.s32 %v282_v4, %v1066_v3  ;;  %v258_v14 = vcombine.high %v256_v13, %v256_v13  ;;  %886 = vst.sshfl [vmem:[#allocation2] sm:$0xf pattern:$0x76325410] %v256_v13  ;;  %vm576_vm11 = vcmask 293888  }
  0x13   : > { %v504_v7 = vrot.slane %v495_v6, %v285_v5  ;;  %v511_v9 = vrot.slane %v497_v8, %v285_v5  ;;  %v411_v12 = vrot.slane %v404_v10, %v285_v5  ;;  %887 = vst.sshfl [vmem:[#allocation2 + $0x8] sm:$0x3 pattern:$0x76325410] %v258_v14 }
  0x15   : > { %512 = vrot.lane.b32.xlu0 %v504_v7, %s1008_s23  ;;  %388 = vrot.lane.b32.xlu1 %v504_v7, %s1009_s24 }
  0x19   : > { %514 = vrot.lane.b32.xlu0 %v511_v9, %s1008_s23  ;;  %421 = vrot.lane.b32.xlu1 %v504_v7, %s1011_s25 }
  0x1d   : > { %419 = vrot.lane.b32.xlu0 %v411_v12, %s1011_s25  ;;  %390 = vrot.lane.b32.xlu1 %v511_v9, %s1009_s24 }
  0x21   : > { %450 = vrot.lane.b32.xlu0 %v504_v7, %s1012_s26  ;;  %452 = vrot.lane.b32.xlu1 %v511_v9, %s1012_s26 }
  0x25   : > { %481 = vrot.lane.b32.xlu0 %v411_v12, %s1013_s27  ;;  %483 = vrot.lane.b32.xlu1 %v504_v7, %s1013_s27 }
  0x29   : > { %296 = vrot.lane.b32.xlu1 %v504_v7, %s1014_s28  ;;  %294 = vrot.lane.b32.xlu0 %v411_v12, %s1014_s28 }
  0x2d   : > { %328 = vrot.lane.b32.xlu1 %v511_v9, %s1015_s29  ;;  %326 = vrot.lane.b32.xlu0 %v504_v7, %s1015_s29 }
  0x31   : > { %359 = vrot.lane.b32.xlu1 %v504_v7, %s1016_s30  ;;  %357 = vrot.lane.b32.xlu0 %v411_v12, %s1016_s30 }
  0x87   : > { %v513_v16 = vpop.permute.xlu0 %512  ;;  %v389_v17 = vpop.permute.xlu1 %388 }
  0x88   : > { %v516_v20 = vrot.slane %v513_v16, 4  ;;  %v392_v29 = vrot.slane %v389_v17, 4 }
  0x8b   : > { %v515_v18 = vpop.permute.xlu0 %514  ;;  %v422_v19 = vpop.permute.xlu1 %421 }
  0x8c   : > { %v517_v21 = vrot.slane %v515_v18, 4  ;;  %v424_v22 = vrot.slane %v422_v19, 4 }
  0x8e   : > { %v518_v23 = vsel %vm300_vm1, %v516_v20, %v517_v21  ;;  %v521_v24 = vsel %vm519_vm2, %v515_v18, %v517_v21  ;;  %v428_v25 = vsel %vm426_vm3, %v422_v19, %v424_v22 }
  0x8f   : > { %v520_v26 = vsel %vm519_vm2, %v513_v16, %v518_v23  ;;  %525 = vst [vmem:[#allocation2 + $0x38] sm:$0x3] %v521_v24  ;;  %432 = vst [vmem:[#allocation2 + $0x20] sm:$0xc] %v428_v25  ;;  %v420_v27 = vpop.permute.xlu0 %419  ;;  %v391_v28 = vpop.permute.xlu1 %390  ;;  %v674_v23 = vld [vmem:[%s1118_s3] sm:$0x7] }
  0x90   : > { %524 = vst [vmem:[#allocation2 + $0x30] sm:$0x33] %v520_v26  ;;  %v423_v30 = vrot.slane %v420_v27, 4  ;;  %v393_v31 = vrot.slane %v391_v28, 4  ;;  %v682_v24 = vsub.s32 1, %v1066_v3  ;;  %v686_v25 = vsub.s32 2, %v1066_v3 }
  0x92   : > { %v425_v32 = vsel %vm300_vm1, %v423_v30, %v424_v22  ;;  %v394_v33 = vsel %vm300_vm1, %v392_v29, %v393_v31  ;;  %v397_v34 = vsel %vm395_vm4, %v391_v28, %v393_v31  ;;  %v255_v22 = vld [vmem:[%s1116_s1] sm:$0xf]  ;;  %v683_v28 = vrot.slane %v674_v23, %v682_v24 }
  0x93   : > { %v427_v35 = vsel %vm426_vm3, %v420_v27, %v425_v32  ;;  %v396_v36 = vsel %vm395_vm4, %v389_v17, %v394_v33  ;;  %401 = vst [vmem:[#allocation2 + $0x20] sm:$0x3] %v397_v34  ;;  %v451_v37 = vpop.permute.xlu0 %450  ;;  %v453_v38 = vpop.permute.xlu1 %452  ;;  %v687_v29 = vrot.slane %v674_v23, %v686_v25 }
  0x94   : > { %431 = vst [vmem:[#allocation2 + $0x18] sm:$0xcc] %v427_v35  ;;  %400 = vst [vmem:[#allocation2 + $0x18] sm:$0x33] %v396_v36  ;;  %v454_v39 = vrot.slane %v451_v37, 4  ;;  %v455_v40 = vrot.slane %v453_v38, 4 }
  0x96   : > { %v456_v41 = vsel %vm300_vm1, %v454_v39, %v455_v40  ;;  %v459_v42 = vsel %vm457_vm5, %v453_v38, %v455_v40  ;;  %v964_v43 = vld [vmem:[#allocation2 + $0x38] ss:$0 sps:$4 sm:$0x33]  }
  0x97   : > { %v458_v44 = vsel %vm457_vm5, %v451_v37, %v456_v41  ;;  %463 = vst [vmem:[#allocation2 + $0x2c] sm:$0x3] %v459_v42  ;;  %v482_v45 = vpop.permute.xlu0 %481  ;;  %v484_v46 = vpop.permute.xlu1 %483  ;;  %v534_v47 = vld [vmem:[#allocation2 + $0x30] sm:$0x33]  ;;  %v588_v51 = vsel %vm580_vm6, %v964_v43, 0 }
  0x98   : > { %462 = vst [vmem:[#allocation2 + $0x24] sm:$0x33] %v458_v44  ;;  %v485_v48 = vrot.slane %v482_v45, 4  ;;  %v486_v49 = vrot.slane %v484_v46, 4  ;;  %v895_v50 = vcombine.high %v534_v47, %v534_v47  ;;  %911 = vmatpush3.bf16.msra.mxu1 %v588_v51  ;;  %v894_v52 = vcombine.low %v534_v47, %v534_v47 }
  0x99   : > { %912 = vmatprep.subr.bf16.mxu1 %v1010_v11 }
  0x9a   : > { %v487_v53 = vsel %vm300_vm1, %v485_v48, %v486_v49  ;;  %v490_v54 = vsel %vm488_vm7, %v484_v46, %v486_v49  ;;  %897 = vmatprep.subr.msk.bf16.mxu0 %vm580_vm6, %v895_v50  ;;  %v582_v56 = vsel %vm580_vm6, %v894_v52, 0 }
  0x9b   : > { %v489_v55 = vsel %vm488_vm7, %v482_v45, %v487_v53  ;;  %494 = vst [vmem:[#allocation2 + $0x2c] sm:$0xc] %v490_v54  ;;  %v297_v57 = vpop.permute.xlu1 %296  ;;  %v295_v58 = vpop.permute.xlu0 %294  ;;  %601 = vmatpush1.bf16.msra.mxu0 %v582_v56  ;;  %v1019_v54 = vmov 1  }
  0x9c   : > { %493 = vst [vmem:[#allocation2 + $0x24] sm:$0xcc] %v489_v55  ;;  %v299_v59 = vrot.slane %v297_v57, 4  ;;  %v298_v60 = vrot.slane %v295_v58, 4  ;;  %960 = vset.pattern.permute.xlu0 %v1019_v54  ;;  %v712_v55 = vld [vmem:[%s1117_s2] sm:$0xff] }
  0x9e   : > { %v304_v61 = vsel %vm302_vm8, %v297_v57, %v299_v59  ;;  %v301_v62 = vsel %vm300_vm1, %v298_v60, %v299_v59 }
  0x9f   : > { %308 = vst [vmem:[#allocation2 + $0x8] sm:$0xc] %v304_v61  ;;  %v303_v63 = vsel %vm302_vm8, %v295_v58, %v301_v62  ;;  %v329_v0 = vpop.permute.xlu1 %328  ;;  %v327_v1 = vpop.permute.xlu0 %326 }
  0xa0   : > { %307 = vst [vmem:[#allocation2] sm:$0xcc] %v303_v63  ;;  %v331_v2 = vrot.slane %v329_v0, 4  ;;  %v330_v4 = vrot.slane %v327_v1, 4 }
  0xa2   : > { %v335_v5 = vsel %vm333_vm9, %v329_v0, %v331_v2  ;;  %v332_v6 = vsel %vm300_vm1, %v330_v4, %v331_v2  ;;  %v966_v7 = vld [vmem:[#allocation2 + $0x20] ss:$12 sps:$4 sm:$0xff]  }
  0xa3   : > { %339 = vst [vmem:[#allocation2 + $0x14] sm:$0x3] %v335_v5  ;;  %v334_v8 = vsel %vm333_vm9, %v327_v1, %v332_v6  ;;  %v360_v9 = vpop.permute.xlu1 %359  ;;  %v358_v10 = vpop.permute.xlu0 %357  ;;  %v967_v12 = vld [vmem:[#allocation2 + $0x1c] ss:$12 sps:$4 sm:$0xff]   ;;  %v969_v13 = vld [vmem:[#allocation2 + $0x18] ss:$12 sps:$4 sm:$0xff]   ;;  %913 = vmatpush3.bf16.msra.mxu1 %v966_v7 }
  0xa4   : > { %338 = vst [vmem:[#allocation2 + $0xc] sm:$0x33] %v334_v8  ;;  %v362_v14 = vrot.slane %v360_v9, 4  ;;  %v361_v15 = vrot.slane %v358_v10, 4  ;;  %602 = vmatprep.subr.bf16.mxu0 %v967_v12  ;;  %914 = vmatprep.subr.bf16.mxu1 %v1010_v11  ;;  %v678_v11 = vsub.s32 0, %v1066_v3 }
  0xa5   : > { %603 = vmatpush1.bf16.msra.mxu0 %v969_v13 }
  0xa6   : > { %v366_v16 = vsel %vm364_vm10, %v360_v9, %v362_v14  ;;  %v363_v17 = vsel %vm300_vm1, %v361_v15, %v362_v14  ;;  %v679_v26 = vrot.slane %v674_v23, %v678_v11 }
  0xa7   : > { %370 = vst [vmem:[#allocation2 + $0x14] sm:$0xc] %v366_v16  ;;  %v365_v18 = vsel %vm364_vm10, %v358_v10, %v363_v17 }
  0xa8   : > { %369 = vst [vmem:[#allocation2 + $0xc] sm:$0xcc] %v365_v18 }
  0xae   : > { %v971_v19 = vld [vmem:[#allocation2 + $0x8] ss:$12 sps:$4 sm:$0xff]  }
  0xaf   : > { %v972_v20 = vld [vmem:[#allocation2 + $0x4] ss:$12 sps:$4 sm:$0xff]   ;;  %v974_v21 = vld [vmem:[#allocation2] ss:$12 sps:$4 sm:$0xff]   ;;  %915 = vmatpush3.bf16.msra.mxu1 %v971_v19 }
  0xb0   : > { %604 = vmatprep.subr.bf16.mxu0 %v972_v20 }
  0xb1   : > { %605 = vmatpush1.bf16.msra.mxu0 %v974_v21 }
  0xb2   : > { %917 = vmatmul.mubr.msk.bf16.vlgmr.msra.gmra.mxu1 %vm576_vm11, %v255_v22 }
  0xb4   : > { %898 = vmatmul.mubr.msk.bf16.vlgmr.msra.gmra.mxu0 %vm576_vm11, %v255_v22 }
 0x172   : > { %v665_v27 = vpop.f32.mrf.mxu1 }
 0x173   : > { %v693_v36 = vmul.f32 %v687_v29, %v665_v27 }
 0x174   : > { %v624_v30 = vpop.f32.mrf.mxu0  ;;  %v918_v31 = vpop.f32.mrf.mxu1 }
 0x175   : > { %v691_v32 = vmul.f32 %v679_v26, %v624_v30  ;;  %v701_v44 = vmul.f32 %v693_v36, %v665_v27 }
 0x176   : > { %v626_v33 = vpop.f32.mrf.mxu0  ;;  %v668_v34 = vpop.f32.mrf.mxu1 }
 0x177   : > { %v692_v35 = vmul.f32 %v683_v28, %v626_v33  ;;  %v699_v39 = vmul.f32 %v691_v32, %v624_v30 }
 0x178   : > { %v628_v37 = vpop.f32.mrf.mxu0  ;;  %v919_v38 = vpop.f32.mrf.mxu1 }
 0x179   : > { %v700_v40 = vmul.f32 %v692_v35, %v626_v33  ;;  %v694_v41 = vadd.f32 %v692_v35, %v691_v32 }
 0x17a   : > { %v629_v42 = vpop.f32.mrf.mxu0 }
 0x17b   : > { %v695_v43 = vadd.f32 %v694_v41, %v693_v36  ;;  %v702_v3 = vadd.f32 %v700_v40, %v699_v39 }
 0x17d   : > { %696 = vadd.xlane.f32.xlu0 %v695_v43  ;;  %v703_v45 = vadd.f32 %v702_v3, %v701_v44 }
 0x17f   : > { %704 = vadd.xlane.f32.xlu1 %v703_v45 }
 0x206   : > { %v697_v46 = vpop.xlane.xlu0 %696 }
 0x207   : > { %v707_v47 = vmul.f32 0.00390625, %v697_v46 }
 0x208   : > { %v705_v48 = vpop.xlane.xlu1 %704 }
 0x209   : > { %v709_v49 = vmul.f32 %v707_v47, %v707_v47  ;;  %v708_v50 = vmul.f32 0.00390625, %v705_v48 }
 0x20b   : > { %v710_v51 = vsub.f32 %v708_v50, %v709_v49 }
 0x20d   : > { %v711_v52 = vmax.f32 %v710_v51, 0.0 }
 0x20f   : > { %v713_v53 = vadd.f32 1e-05, %v711_v52 }
 0x211   : > { %975 = vrsqrt.f32 %v713_v53 }
 0x21e   : > { %v976_v56 = vpop.eup %975 }
 0x21f   : > { %v715_v57 = vmul.f32 %v976_v56, %v712_v55 }
 0x221   : > { %727 = vperm.xlu1 %959, %v715_v57   ;;  %v716_v58 = vmul.f32 %v715_v57, %v707_v47 }
 0x223   : > { %718 = vrot.lane.b32.xlu0 %v716_v58, %s1020_s11 }
 0x295   : > { %v719_v59 = vpop.permute.xlu0 %718 }
 0x296   : > { %v721_v60 = vsub.f32 %v712_v55, %v719_v59 }
 0x298   : > { %735 = vperm.xlu0 %960, %v721_v60  }
 0x29c   : > { %v728_v61 = vpop.permute.xlu1 %727 }
 0x29d   : > { %v730_v62 = vmul.f32 %v728_v61, %v624_v30  ;;  %v731_v63 = vmul.f32 %v728_v61, %v626_v33  ;;  %v732_v0 = vmul.f32 %v728_v61, %v665_v27 }
 0x313   : > { %v736_v1 = vpop.permute.xlu0 %735 }
 0x314   : > { %v738_v2 = vadd.f32 %v736_v1, %v730_v62  ;;  %v739_v4 = vadd.f32 %v736_v1, %v731_v63  ;;  %v740_v5 = vadd.f32 %v736_v1, %v732_v0 }
 0x316   : > { %v744_v6 = vmin.f32 %v738_v2, 0.0  ;;  %v745_v7 = vmin.f32 %v739_v4, 0.0  ;;  %v746_v8 = vmin.f32 %v740_v5, 0.0  ;;  %vm741_vm12 = vcmp.gt.f32.partialorder %v738_v2, 0.0 }
 0x317   : > { %vm742_vm13 = vcmp.gt.f32.partialorder %v739_v4, 0.0  ;;  %vm743_vm14 = vcmp.gt.f32.partialorder %v740_v5, 0.0 }
 0x318   : > { %v747_v9 = vmul.f32 1.442695, %v744_v6  ;;  %v749_v10 = vmul.f32 1.442695, %v745_v7  ;;  %v751_v12 = vmul.f32 1.442695, %v746_v8 }
 0x31a   : > { %977 = vpow2.f32 %v747_v9 }
 0x31b   : > { %979 = vpow2.f32 %v749_v10 }
 0x31c   : > { %981 = vpow2.f32 %v751_v12 }
 0x327   : > { %v978_v13 = vpop.eup %977 }
 0x328   : > { %v980_v14 = vpop.eup %979  ;;  %v900_v15 = vadd.f32 -1.0, %v978_v13 }
 0x329   : > { %v982_v16 = vpop.eup %981  ;;  %v901_v17 = vadd.f32 -1.0, %v980_v14 }
 0x32a   : > { %v902_v18 = vadd.f32 -1.0, %v982_v16  ;;  %v756_v19 = vsel %vm741_vm12, %v738_v2, %v900_v15 }
 0x32b   : > { %v757_v20 = vsel %vm742_vm13, %v739_v4, %v901_v17  ;;  %759 = vst [vmem:[%s253_s19] sm:$0xff] %v756_v19 }
 0x32c   : > { %v758_v21 = vsel %vm743_vm14, %v740_v5, %v902_v18  ;;  %760 = vst [vmem:[%s253_s19 + $0x8] sm:$0xff] %v757_v20 }
 0x32d   : > { %761 = vst [vmem:[%s253_s19 + $0x10] sm:$0xff] %v758_v21 }
 0x32e PF: > { %s14_s17 = sadd.s32 1, %s1005_s17   ;;  %s1120_s15 = smov %s1001_s16 }
 0x32f   : > { %p11_p5 = scmp.ge.s32.totalorder %s14_s17, 4   ;;  %s1121_s16 = smov %s1123_s18 }
 0x331   :  { %13 = sbr.rel (!%p11_p5) target bundleno = 2 (0x2), region = 72 }

</bundles_post_ra>
